<compile_context>
chip_gen: v7x
topology: tpu7x:2x2x1
jax: 0.10.0
libtpu: 0.0.40
codegen_flags: <defaults>
</compile_context>

<pallas_src>
import jax
import jax.numpy as jnp
from jax.experimental import pallas as pl
from jax.experimental.pallas import tpu as pltpu

_LANE = 128
_VMEM_STAGE_BUDGET = 8 << 20     # bytes for ONE input tile + ONE output tile
_VMEM_LIMIT = 32 << 20           # explicit scoped-VMEM limit (safe on v5e..v7x)
_MIN_GRID_STEPS = 8              # keep the DMA pipeline + both v7x TCs busy
_RAGGED_TILE_ELEMS = 64 * 1024   # lane-axis tile for the ragged (1, n) path


def _sublane(dtype) -> int:
    # Native sublane packing: 8 for 4-byte, 16 for 2-byte, 32 for 1-byte dtypes.
    return {4: 8, 2: 16, 1: 32}.get(jnp.dtype(dtype).itemsize, 8)


def _round_up(x, m):
    return ((x + m - 1) // m) * m


def _choose_tile_rows(rows, in_item, out_item, sub):
    """Row-tile for the (rows, 128) view, sized by in+out bytes per row."""
    bytes_per_row = _LANE * (in_item + out_item)
    cap = max(sub, (_VMEM_STAGE_BUDGET // bytes_per_row) // sub * sub)
    if rows <= _MIN_GRID_STEPS * sub:
        return rows                       # tiny tensor: one full-extent block
    want = _round_up(pl.cdiv(rows, _MIN_GRID_STEPS), sub)
    return min(cap, want)


def _bias_kernel(w_ref, x_ref, o_ref):
    # w_ref: (1,) f32 scalar in SMEM.  x_ref/o_ref: VMEM tiles (rank-agnostic).
    if x_ref.dtype == o_ref.dtype:
        # Native-dtype splat add (uses bf16 VALUs on v6e/v7x; no f32 round-trip).
        o_ref[...] = x_ref[...] + w_ref[0].astype(o_ref.dtype)
    else:
        # Promotion path (e.g. bf16 input + f32 weight -> f32 output).
        o_ref[...] = (x_ref[...].astype(jnp.float32) + w_ref[0]).astype(o_ref.dtype)


def bias_forward(x, weight, *, tile_rows=None, ragged_tile_elems=None):
    """out = x + weight  (scalar broadcast), matching `Bias.forward`.

    tile_rows / ragged_tile_elems are test overrides; if given they should be
    multiples of the sublane packing / of 128 respectively.
    """
    orig_shape = x.shape
    w_arr = jnp.asarray(weight)
    out_dtype = jnp.result_type(x.dtype, w_arr.dtype)
    n = int(x.size)
    if n == 0:
        return jnp.zeros(orig_shape, out_dtype)

    w_smem = w_arr.reshape((1,)).astype(jnp.float32)
    in_item = jnp.dtype(x.dtype).itemsize
    out_item = jnp.dtype(out_dtype).itemsize
    flat = x.reshape(-1)

    cparams = pltpu.CompilerParams(
        dimension_semantics=("parallel",),
        vmem_limit_bytes=_VMEM_LIMIT,
    )
    cost = pl.CostEstimate(
        flops=n, transcendentals=0, bytes_accessed=n * (in_item + out_item))

    if n % _LANE == 0:
        # ---- aligned path: zero-copy (rows, 128) lane-dense view ----
        rows = n // _LANE
        sub = _sublane(x.dtype)
        if tile_rows is None:
            tile_r = _choose_tile_rows(rows, in_item, out_item, sub)
        else:
            tile_r = tile_rows
        tile_r = min(tile_r, rows)

        out = pl.pallas_call(
            _bias_kernel,
            out_shape=jax.ShapeDtypeStruct((rows, _LANE), out_dtype),
            grid=(pl.cdiv(rows, tile_r),),            # partial last block masked
            in_specs=[
                pl.BlockSpec(memory_space=pltpu.MemorySpace.SMEM),  # scalar w
                pl.BlockSpec((tile_r, _LANE), lambda i: (i, 0)),    # input tile
            ],
            out_specs=pl.BlockSpec((tile_r, _LANE), lambda i: (i, 0)),
            compiler_params=cparams,
            cost_estimate=cost,
        )(w_smem, flat.reshape(rows, _LANE))
    else:
        # ---- ragged path: (1, n) view, lane-axis tiling, masked final block.
        # No pad / slice copies: HBM traffic stays at 1 read + 1 write.
        blk = _RAGGED_TILE_ELEMS if ragged_tile_elems is None else ragged_tile_elems
        blk = min(blk, n)                 # blk == n (full dim) is always legal

        out = pl.pallas_call(
            _bias_kernel,
            out_shape=jax.ShapeDtypeStruct((1, n), out_dtype),
            grid=(pl.cdiv(n, blk),),
            in_specs=[
                pl.BlockSpec(memory_space=pltpu.MemorySpace.SMEM),
                pl.BlockSpec((1, blk), lambda i: (0, i)),
            ],
            out_specs=pl.BlockSpec((1, blk), lambda i: (0, i)),
            compiler_params=cparams,
            cost_estimate=cost,
        )(w_smem, flat.reshape(1, n))

    return out.reshape(orig_shape)


if __name__ == "__main__":
    key = jax.random.PRNGKey(0)

    # Parameter init matches Bias.__init__ / reset_parameters: single zero scalar.
    weight = jnp.zeros((1,), dtype=jnp.float32)

    # 1) Small NCHW feature map (aligned path, single block).
    x = jax.random.normal(key, (2, 4, 16, 16), dtype=jnp.float32)
    out = jax.block_until_ready(bias_forward(x, weight))
    ref = x + weight[0]
    assert out.shape == x.shape and out.dtype == ref.dtype
    assert jnp.array_equal(out, ref)

    k1, k2, k3, k4 = jax.random.split(key, 4)
    w2 = jnp.full((1,), 0.5, dtype=jnp.float32)

    # 2) Ragged numel (105 elems), single (1, n) block — no pad/slice copies.
    x2 = jax.random.normal(k1, (3, 5, 7), dtype=jnp.float32)
    out2 = jax.block_until_ready(bias_forward(x2, w2))
    assert jnp.array_equal(out2, x2 + w2[0])

    # 3) Ragged numel with a multi-step grid and a masked partial final block.
    x3 = jax.random.normal(k2, (5, 77), dtype=jnp.float32)        # 385 elems
    out3 = jax.block_until_ready(bias_forward(x3, w2, ragged_tile_elems=128))
    assert jnp.array_equal(out3, x3 + w2[0])

    # 4) Aligned path, multi-block pipelined grid where rows % tile_r != 0
    #    (exercises partial-block masking on the 2-D path).
    x4 = jax.random.normal(k3, (1, 1000, 128), dtype=jnp.float32)  # rows = 1000
    out4 = jax.block_until_ready(bias_forward(x4, w2, tile_rows=128))
    assert jnp.array_equal(out4, x4 + w2[0])

    # 5) bf16 input + f32 weight: promoted f32 output (f32 compute path).
    x5 = jax.random.normal(k4, (4, 8, 32), dtype=jnp.bfloat16)
    out5 = jax.block_until_ready(bias_forward(x5, w2))
    ref5 = x5.astype(jnp.float32) + w2[0]
    assert out5.dtype == jnp.float32
    assert jnp.allclose(out5, ref5, atol=0.0, rtol=0.0)

    # 6) bf16 input + bf16 weight: native-dtype compute path (no f32 round-trip).
    w_bf16 = jnp.full((1,), 0.25, dtype=jnp.bfloat16)
    out6 = jax.block_until_ready(bias_forward(x5, w_bf16))
    ref6 = x5 + w_bf16[0]
    assert out6.dtype == jnp.bfloat16
    assert jnp.allclose(out6.astype(jnp.float32), ref6.astype(jnp.float32),
                        atol=1e-2, rtol=1e-2)

    print("KERNEL_OK")
</pallas_src>

<mosaic_0001>
module attributes {stable_mosaic.version = 11 : i64} {
  func.func @_bias_kernel(%arg0: i32, %arg1: memref<1xf32, #tpu.memory_space<smem>>, %arg2: memref<16x128xf32, #tpu.memory_space<vmem>>, %arg3: memref<16x128xf32, #tpu.memory_space<vmem>>) attributes {dimension_semantics = [#tpu.dimension_semantics<parallel>], iteration_bounds = array<i64: 1>, scalar_prefetch = 0 : i64, scratch_operands = 0 : i64, tpu.core_type = #tpu.core_type<tc>, window_params = [{transform_indices = @transform_0, window_bounds = array<i64: 1>}, {transform_indices = @transform_1, window_bounds = array<i64: 16, 128>}, {transform_indices = @transform_2, window_bounds = array<i64: 16, 128>}]} {
    %c0 = arith.constant 0 : index
    %c0_0 = arith.constant 0 : index
    %0 = vector.load %arg2[%c0, %c0_0] : memref<16x128xf32, #tpu.memory_space<vmem>>, vector<16x128xf32>
    %c0_1 = arith.constant 0 : index
    %1 = memref.load %arg1[%c0_1] : memref<1xf32, #tpu.memory_space<smem>>
    %2 = vector.broadcast %1 : f32 to vector<16x128xf32>
    %3 = arith.addf %0, %2 : vector<16x128xf32>
    %c0_2 = arith.constant 0 : index
    %c0_3 = arith.constant 0 : index
    %4 = vector.load %arg3[%c0_2, %c0_3] : memref<16x128xf32, #tpu.memory_space<vmem>>, vector<16x128xf32>
    tpu.vector_store %arg3[%c0_2, %c0_3], %3 {strides = array<i32>} : memref<16x128xf32, #tpu.memory_space<vmem>>, vector<16x128xf32>,
    return
  }
  func.func @transform_0(%arg0: i32) -> i32 {
    %c0_i32 = arith.constant 0 : i32
    %c0_i32_0 = arith.constant 0 : i32
    return %c0_i32 : i32
  }
  func.func @transform_1(%arg0: i32) -> (i32, i32) {
    %c0_i32 = arith.constant 0 : i32
    %c0_i32_0 = arith.constant 0 : i32
    return %arg0, %c0_i32 : i32, i32
  }
  func.func @transform_2(%arg0: i32) -> (i32, i32) {
    %c0_i32 = arith.constant 0 : i32
    %c0_i32_0 = arith.constant 0 : i32
    return %arg0, %c0_i32 : i32, i32
  }
}

</mosaic_0001>

<bundles_post_ra>
// kernel: tpu_custom_call.1
= control target key start
LH: loop header
LB: loop body
LE: loop exit
PB: predicated region body
PF: predicated region fallthrough
CT: control target
= control target key end

     0   :  { %8 = vsyncpa [#allocation4], 0  ;;  %s156_s0 = inlined_call_operand.<no memory space> [shape: f32[1], index: 0, kind: input, shape index: {}]   ;;  %s157_s1 = inlined_call_operand.hbm [shape: f32[16,128], index: 1, kind: input, shape index: {}]   ;;  %s158_s2 = inlined_call_operand.hbm [shape: f32[16,128], index: 2, kind: output, shape index: {}]  }
   0x1   :  { %9 = vsyncpa [#allocation5], 0  ;;  %s104_s9 = smov [#allocation3]   ;;  %s56_s13 = scalar_lea.hbm %s157_s1, 256 }
   0x2   :  { %s17_s10 = sshll.u32 %s104_s9, 4  ;;  %p57_p0 = scmp.ne.s32.totalorder %s157_s1, %s56_s13  ;;  %s18_s10 = int_to_ptr.vmem [resolvable:$true] %s17_s10 }
   0x3   :  { %p60_p1 = scmp.lt.u32.totalorder %s56_s13, %s157_s1 }
   0x5   :  { %p62_p2 = pnand %p60_p1, %p57_p0 }
   0x7   :  { %65 = shalt.err (!%p62_p2)
}
   0x8   :  { %s66_s18 = scalar_lea.vmem %s18_s10, 256  ;;  %p71_p4 = scmp.lt.s32.totalorder %s18_s10, %s18_s10 }
   0x9   :  { %p67_p3 = scmp.ne.s32.totalorder %s18_s10, %s66_s18  ;;  %p72_p5 = scmp.lt.s32.totalorder %s66_s18, %s66_s18 }
   0xb   :  { %p73_p6 = por %p72_p5, %p71_p4 }
   0xd   :  { %p74_p7 = pnand %p73_p6, %p67_p3 }
   0xf   :  { %77 = shalt.err (!%p74_p7)
}
  0x10   :  { %s105_s19 = smov 128   ;;  %s106_s20 = smov 8  }
  0x11   :  { %23 = dma.hbm_to_vmem [thread:$0]  %s157_s1, 256, %s18_s10, [#allocation4], %s105_s19, %s105_s19, %s106_s20  }
  0x12   :  { %100 = dma.done.wait [#allocation4], 256  }
  0x13   :  { %101 = vsyncadd [#allocation4], 4294967040  ;;  %v30_v0 = vstv %s156_s0  ;;  %s107_s25 = smov [#allocation6]   ;;  %v27_v1 = vld [vmem:[#allocation3] sm:$0xff]  ;;  %v28_v2 = vld [vmem:[#allocation3 + $0x8] sm:$0xff] }
  0x14   :  { %s40_s26 = sshll.u32 %s107_s25, 4  ;;  %v31_v3 = vadd.f32 %v30_v0, %v27_v1  ;;  %v32_v4 = vadd.f32 %v30_v0, %v28_v2  ;;  %s41_s26 = int_to_ptr.vmem [resolvable:$true] %s40_s26 }
  0x15   :  { %s78_s27 = scalar_lea.vmem %s41_s26, 256  ;;  %p83_p9 = scmp.lt.s32.totalorder %s41_s26, %s41_s26 }
  0x16   :  { %33 = vst [vmem:[#allocation6] sm:$0xff] %v31_v3  ;;  %34 = vst [vmem:[#allocation6 + $0x8] sm:$0xff] %v32_v4  ;;  %p79_p8 = scmp.ne.s32.totalorder %s41_s26, %s78_s27  ;;  %p84_p10 = scmp.lt.s32.totalorder %s78_s27, %s78_s27 }
  0x18   :  { %p85_p11 = por %p84_p10, %p83_p9 }
  0x1a   :  { %p86_p12 = pnand %p85_p11, %p79_p8 }
  0x1c   :  { %89 = shalt.err (!%p86_p12)
}
  0x1d   :  { %s90_s0 = scalar_lea.hbm %s158_s2, 256 }
  0x1e   :  { %p91_p13 = scmp.ne.s32.totalorder %s158_s2, %s90_s0  ;;  %p94_p0 = scmp.lt.u32.totalorder %s90_s0, %s158_s2 }
  0x20   :  { %p96_p1 = pnand %p94_p0, %p91_p13 }
  0x22   :  { %99 = shalt.err (!%p96_p1)
}
  0x23   :  { %46 = dma.vmem_to_hbm [thread:$0]  %s41_s26, 256, %s158_s2, [#allocation5], %s105_s19, %s105_s19, %s106_s20  }
  0x24   :  { %102 = dma.done.wait [#allocation5], 256  }
  0x25   :  { %103 = vsyncadd [#allocation5], 4294967040 }
  0x26   :  { %50 = vsyncpa [#allocation4], 1 }
  0x27   :  { %51 = vsyncpa [#allocation5], 1 }

</bundles_post_ra>
